<compile_context>
chip_gen: v6e
topology: v6e:2x2x1
jax: 0.10.0
libtpu: 0.0.40
codegen_flags: <defaults>
</compile_context>

<pallas_src>
import math
import jax
import jax.numpy as jnp
from jax.experimental import pallas as pl
from jax.experimental.pallas import tpu as pltpu


def _round_up(a, b):
    return (a + b - 1) // b * b


def mlp_kernel(x_ref, wfc_ref, bfc_ref, wproj_ref, bproj_ref, o_ref, acc_ref):
    h_idx = pl.program_id(1)

    @pl.when(h_idx == 0)
    def _():
        acc_ref[...] = jnp.zeros_like(acc_ref)

    # Cast the streamed f32 activation tile on the VPU (in-kernel cast).
    x = x_ref[...].astype(wfc_ref.dtype)

    # ---- c_fc chunk: [tm, D] @ [D, th] (bf16 in, f32 accumulate) + bias ----
    h = jnp.dot(x, wfc_ref[...], preferred_element_type=jnp.float32)
    h = h + bfc_ref[...]

    # ---- GELU (tanh approximation) in f32, identical to nn.GELU('tanh') ----
    c = math.sqrt(2.0 / math.pi)
    g = 0.5 * h * (1.0 + jnp.tanh(c * (h + 0.044715 * (h * h * h))))

    # ---- c_proj chunk: [tm, th] @ [th, D], accumulated over H chunks ----
    acc_ref[...] += jnp.dot(g.astype(wproj_ref.dtype), wproj_ref[...],
                            preferred_element_type=jnp.float32)

    @pl.when(h_idx == pl.num_programs(1) - 1)
    def _():
        o_ref[...] = (acc_ref[...] + bproj_ref[...]).astype(o_ref.dtype)


def mlp_pallas(x, w_fc, b_fc, w_proj, b_proj, *, tm=512, th=1024,
               compute_dtype=jnp.bfloat16, out_dtype=None):
    """x: [M, D]; w_fc: [D, H]; b_fc: [H]; w_proj: [H, D]; b_proj: [D].

    For best performance pass w_fc / w_proj already converted to
    `compute_dtype` once at init time (avoids a per-call HBM cast pass).
    """
    M, D = x.shape
    H = w_fc.shape[1]
    out_dtype = x.dtype if out_dtype is None else out_dtype

    # ---- Row tile: multiple of 128 (MXU rows) for large M, 16 for small M.
    if M >= 128:
        tm_eff = min(_round_up(tm, 128), _round_up(M, 128))
    else:
        tm_eff = _round_up(M, 16)
    M_pad = _round_up(M, tm_eff)
    if M_pad != M:
        x = jnp.pad(x, ((0, M_pad - M), (0, 0)))

    # ---- Hidden-dim chunk: multiple of 128 lanes.
    th_eff = min(_round_up(th, 128), _round_up(H, 128))
    H_pad = _round_up(H, th_eff)

    # Fallback cast only (expected no-op: convert weights once at init).
    w_fc_c = w_fc if w_fc.dtype == compute_dtype else w_fc.astype(compute_dtype)
    w_proj_c = (w_proj if w_proj.dtype == compute_dtype
                else w_proj.astype(compute_dtype))

    if H_pad != H:
        # Zero-padded hidden columns: h=0 -> gelu(0)=0 -> zero contribution.
        w_fc_c = jnp.pad(w_fc_c, ((0, 0), (0, H_pad - H)))
        b_fc = jnp.pad(b_fc, (0, H_pad - H))
        w_proj_c = jnp.pad(w_proj_c, ((0, H_pad - H), (0, 0)))

    b_fc2 = b_fc.reshape(1, H_pad).astype(jnp.float32)
    b_proj2 = b_proj.reshape(1, D).astype(jnp.float32)

    nm = M_pad // tm_eff
    nh = H_pad // th_eff
    grid = (nm, nh)

    cbytes = jnp.dtype(compute_dtype).itemsize
    xbytes = jnp.dtype(x.dtype).itemsize
    obytes = jnp.dtype(out_dtype).itemsize

    # ---- VMEM budget (double-buffered inputs/outputs + scratch + temps),
    # capped at 48 MiB so it is safe on v7x's 64 MiB/TC physical VMEM.
    vmem_needed = (
        2 * tm_eff * D * xbytes          # x tile (streamed f32)
        + 2 * D * th_eff * cbytes        # W_fc chunk
        + 2 * th_eff * 4                 # b_fc chunk
        + 2 * th_eff * D * cbytes        # W_proj chunk
        + 2 * D * 4                      # b_proj
        + 2 * tm_eff * D * obytes        # out tile
        + tm_eff * D * 4                 # f32 accumulator scratch
        + 2 * tm_eff * th_eff * 4        # f32 h / gelu temporaries
        + tm_eff * D * cbytes            # in-kernel bf16 copy of x
    )
    vmem_limit = min(48 << 20, max(32 << 20, int(vmem_needed * 1.5) + (2 << 20)))

    cost = pl.CostEstimate(
        flops=4 * M_pad * D * H_pad,      # two matmuls
        transcendentals=M_pad * H_pad,    # tanh in GELU
        bytes_accessed=(M_pad * D * xbytes
                        + nm * (D * H_pad * cbytes + H_pad * 4
                                + H_pad * D * cbytes)
                        + D * 4
                        + M_pad * D * obytes),
    )

    out = pl.pallas_call(
        mlp_kernel,
        out_shape=jax.ShapeDtypeStruct((M_pad, D), out_dtype),
        grid_spec=pltpu.PrefetchScalarGridSpec(
            num_scalar_prefetch=0,
            grid=grid,
            in_specs=[
                pl.BlockSpec((tm_eff, D), lambda i, h: (i, 0)),     # x row tile
                pl.BlockSpec((D, th_eff), lambda i, h: (0, h)),     # W_fc chunk
                pl.BlockSpec((1, th_eff), lambda i, h: (0, h)),     # b_fc chunk
                pl.BlockSpec((th_eff, D), lambda i, h: (h, 0)),     # W_proj chunk
                pl.BlockSpec((1, D), lambda i, h: (0, 0)),          # b_proj
            ],
            out_specs=pl.BlockSpec((tm_eff, D), lambda i, h: (i, 0)),
            scratch_shapes=[pltpu.VMEM((tm_eff, D), jnp.float32)],
        ),
        compiler_params=pltpu.CompilerParams(
            dimension_semantics=("parallel", "arbitrary"),
            vmem_limit_bytes=vmem_limit,
        ),
        cost_estimate=cost,
    )(x, w_fc_c, b_fc2, w_proj_c, b_proj2)

    if M_pad != M:
        out = out[:M]
    return out


def mlp_ref(x, w_fc, b_fc, w_proj, b_proj):
    h = x @ w_fc + b_fc
    c = math.sqrt(2.0 / math.pi)
    g = 0.5 * h * (1.0 + jnp.tanh(c * (h + 0.044715 * h ** 3)))
    return g @ w_proj + b_proj


if __name__ == "__main__":
    # Small GPT-2-like config: batch=2, seq=8, n_embd=32 (hidden = 4*32 = 128).
    B, T, n_embd = 2, 8, 32
    hidden = 4 * n_embd

    key = jax.random.PRNGKey(0)
    kx, k1, k2, k3, k4 = jax.random.split(key, 5)

    x = jax.random.normal(kx, (B, T, n_embd), dtype=jnp.float32)

    # Deterministic init mimicking nn.Linear: U(-1/sqrt(fan_in), 1/sqrt(fan_in)).
    lim1 = 1.0 / math.sqrt(n_embd)
    lim2 = 1.0 / math.sqrt(hidden)
    # Stored as [in, out] (transpose of PyTorch's [out, in] weight).
    w_fc = jax.random.uniform(k1, (n_embd, hidden), jnp.float32, -lim1, lim1)
    b_fc = jax.random.uniform(k2, (hidden,), jnp.float32, -lim1, lim1)
    w_proj = jax.random.uniform(k3, (hidden, n_embd), jnp.float32, -lim2, lim2)
    b_proj = jax.random.uniform(k4, (n_embd,), jnp.float32, -lim2, lim2)

    # Init-time weight conversion (done ONCE, not per forward call).
    w_fc_bf16 = w_fc.astype(jnp.bfloat16)
    w_proj_bf16 = w_proj.astype(jnp.bfloat16)

    x2d = x.reshape(B * T, n_embd)
    out = mlp_pallas(x2d, w_fc_bf16, b_fc, w_proj_bf16, b_proj)
    out = jax.block_until_ready(out).reshape(B, T, n_embd)

    ref = mlp_ref(x2d, w_fc, b_fc, w_proj, b_proj).reshape(B, T, n_embd)
    assert out.shape == (B, T, n_embd)
    # bf16 matmul inputs with f32 accumulation -> slightly looser tolerance
    # than the pure-f32 PyTorch reference.
    assert jnp.allclose(out, ref, atol=3e-2, rtol=3e-2), (
        float(jnp.max(jnp.abs(out - ref))))

    print("KERNEL_OK")
</pallas_src>

<mosaic_0001>
module attributes {stable_mosaic.version = 11 : i64} {
  func.func @mlp_kernel(%arg0: i32, %arg1: i32, %arg2: memref<16x32xf32, #tpu.memory_space<vmem>>, %arg3: memref<32x128xbf16, #tpu.memory_space<vmem>>, %arg4: memref<1x128xf32, #tpu.memory_space<vmem>>, %arg5: memref<128x32xbf16, #tpu.memory_space<vmem>>, %arg6: memref<1x32xf32, #tpu.memory_space<vmem>>, %arg7: memref<16x32xf32, #tpu.memory_space<vmem>>, %arg8: memref<16x32xf32, #tpu.memory_space<vmem>>) attributes {dimension_semantics = [#tpu.dimension_semantics<parallel>, #tpu.dimension_semantics<arbitrary>], iteration_bounds = array<i64: 1, 1>, scalar_prefetch = 0 : i64, scratch_operands = 1 : i64, tpu.core_type = #tpu.core_type<tc>, window_params = [{transform_indices = @transform_0, window_bounds = array<i64: 16, 32>}, {transform_indices = @transform_1, window_bounds = array<i64: 32, 128>}, {transform_indices = @transform_2, window_bounds = array<i64: 1, 128>}, {transform_indices = @transform_3, window_bounds = array<i64: 128, 32>}, {pipeline_mode = #tpu.pipeline_mode<synchronous>, transform_indices = @transform_4, window_bounds = array<i64: 1, 32>}, {transform_indices = @transform_5, window_bounds = array<i64: 16, 32>}]} {
    %c0_i32 = arith.constant 0 : i32
    %0 = arith.cmpi eq, %arg1, %c0_i32 : i32
    %1 = arith.extui %0 : i1 to i32
    %c0_i32_0 = arith.constant 0 : i32
    %2 = arith.cmpi ne, %1, %c0_i32_0 : i32
    scf.if %2 {
      %cst_19 = arith.constant 0.000000e+00 : f32
      %32 = vector.broadcast %cst_19 : f32 to vector<16x32xf32>
      %c0_20 = arith.constant 0 : index
      %c0_21 = arith.constant 0 : index
      %33 = vector.load %arg8[%c0_20, %c0_21] : memref<16x32xf32, #tpu.memory_space<vmem>>, vector<16x32xf32>
      tpu.vector_store %arg8[%c0_20, %c0_21], %32 {strides = array<i32>} : memref<16x32xf32, #tpu.memory_space<vmem>>, vector<16x32xf32>,
    } else {
    }
    %c0 = arith.constant 0 : index
    %c0_1 = arith.constant 0 : index
    %3 = vector.load %arg2[%c0, %c0_1] : memref<16x32xf32, #tpu.memory_space<vmem>>, vector<16x32xf32>
    %4 = arith.truncf %3 : vector<16x32xf32> to vector<16x32xbf16>
    %c0_2 = arith.constant 0 : index
    %c0_3 = arith.constant 0 : index
    %5 = vector.load %arg3[%c0_2, %c0_3] : memref<32x128xbf16, #tpu.memory_space<vmem>>, vector<32x128xbf16>
    %cst = arith.constant dense<0.000000e+00> : vector<16x128xf32>
    %6 = tpu.matmul %4, %5, %cst {dimension_numbers = #tpu.dot_dimension_numbers<[1], [0], [0], [1], [0, 0, 1, 1], [], []>} : vector<16x32xbf16>, vector<32x128xbf16>, vector<16x128xf32> -> vector<16x128xf32>
    %c0_4 = arith.constant 0 : index
    %c0_5 = arith.constant 0 : index
    %7 = vector.load %arg4[%c0_4, %c0_5] : memref<1x128xf32, #tpu.memory_space<vmem>>, vector<1x128xf32>
    %8 = vector.broadcast %7 : vector<1x128xf32> to vector<16x128xf32>
    %9 = arith.addf %6, %8 : vector<16x128xf32>
    %cst_6 = arith.constant 5.000000e-01 : f32
    %10 = vector.broadcast %cst_6 : f32 to vector<16x128xf32>
    %11 = arith.mulf %10, %9 : vector<16x128xf32>
    %12 = arith.mulf %9, %9 : vector<16x128xf32>
    %13 = arith.mulf %12, %9 : vector<16x128xf32>
    %cst_7 = arith.constant 4.471500e-02 : f32
    %14 = vector.broadcast %cst_7 : f32 to vector<16x128xf32>
    %15 = arith.mulf %14, %13 : vector<16x128xf32>
    %16 = arith.addf %9, %15 : vector<16x128xf32>
    %cst_8 = arith.constant 0.797884583 : f32
    %17 = vector.broadcast %cst_8 : f32 to vector<16x128xf32>
    %18 = arith.mulf %17, %16 : vector<16x128xf32>
    %19 = math.tanh %18 : vector<16x128xf32>
    %cst_9 = arith.constant 1.000000e+00 : f32
    %20 = vector.broadcast %cst_9 : f32 to vector<16x128xf32>
    %21 = arith.addf %20, %19 : vector<16x128xf32>
    %22 = arith.mulf %11, %21 : vector<16x128xf32>
    %c0_10 = arith.constant 0 : index
    %c0_11 = arith.constant 0 : index
    %23 = vector.load %arg8[%c0_10, %c0_11] : memref<16x32xf32, #tpu.memory_space<vmem>>, vector<16x32xf32>
    %24 = arith.truncf %22 : vector<16x128xf32> to vector<16x128xbf16>
    %c0_12 = arith.constant 0 : index
    %c0_13 = arith.constant 0 : index
    %25 = vector.load %arg5[%c0_12, %c0_13] : memref<128x32xbf16, #tpu.memory_space<vmem>>, vector<128x32xbf16>
    %cst_14 = arith.constant dense<0.000000e+00> : vector<16x32xf32>
    %26 = tpu.matmul %24, %25, %cst_14 {dimension_numbers = #tpu.dot_dimension_numbers<[1], [0], [0], [1], [0, 0, 1, 1], [], []>} : vector<16x128xbf16>, vector<128x32xbf16>, vector<16x32xf32> -> vector<16x32xf32>
    %27 = arith.addf %23, %26 : vector<16x32xf32>
    %c0_15 = arith.constant 0 : index
    %c0_16 = arith.constant 0 : index
    %28 = vector.load %arg8[%c0_15, %c0_16] : memref<16x32xf32, #tpu.memory_space<vmem>>, vector<16x32xf32>
    tpu.vector_store %arg8[%c0_15, %c0_16], %27 {strides = array<i32>} : memref<16x32xf32, #tpu.memory_space<vmem>>, vector<16x32xf32>,
    %c0_i32_17 = arith.constant 0 : i32
    %29 = arith.cmpi eq, %arg1, %c0_i32_17 : i32
    %30 = arith.extui %29 : i1 to i32
    %c0_i32_18 = arith.constant 0 : i32
    %31 = arith.cmpi ne, %30, %c0_i32_18 : i32
    scf.if %31 {
      %c0_19 = arith.constant 0 : index
      %c0_20 = arith.constant 0 : index
      %32 = vector.load %arg8[%c0_19, %c0_20] : memref<16x32xf32, #tpu.memory_space<vmem>>, vector<16x32xf32>
      %c0_21 = arith.constant 0 : index
      %c0_22 = arith.constant 0 : index
      %33 = vector.load %arg6[%c0_21, %c0_22] : memref<1x32xf32, #tpu.memory_space<vmem>>, vector<1x32xf32>
      %34 = vector.broadcast %33 : vector<1x32xf32> to vector<16x32xf32>
      %35 = arith.addf %32, %34 : vector<16x32xf32>
      %c0_23 = arith.constant 0 : index
      %c0_24 = arith.constant 0 : index
      %36 = vector.load %arg7[%c0_23, %c0_24] : memref<16x32xf32, #tpu.memory_space<vmem>>, vector<16x32xf32>
      tpu.vector_store %arg7[%c0_23, %c0_24], %35 {strides = array<i32>} : memref<16x32xf32, #tpu.memory_space<vmem>>, vector<16x32xf32>,
    } else {
    }
    return
  }
  func.func @transform_0(%arg0: i32, %arg1: i32) -> (i32, i32) {
    %c0_i32 = arith.constant 0 : i32
    %c0_i32_0 = arith.constant 0 : i32
    return %arg0, %c0_i32 : i32, i32
  }
  func.func @transform_1(%arg0: i32, %arg1: i32) -> (i32, i32) {
    %c0_i32 = arith.constant 0 : i32
    %c0_i32_0 = arith.constant 0 : i32
    return %c0_i32, %arg1 : i32, i32
  }
  func.func @transform_2(%arg0: i32, %arg1: i32) -> (i32, i32) {
    %c0_i32 = arith.constant 0 : i32
    %c0_i32_0 = arith.constant 0 : i32
    return %c0_i32, %arg1 : i32, i32
  }
  func.func @transform_3(%arg0: i32, %arg1: i32) -> (i32, i32) {
    %c0_i32 = arith.constant 0 : i32
    %c0_i32_0 = arith.constant 0 : i32
    return %arg1, %c0_i32 : i32, i32
  }
  func.func @transform_4(%arg0: i32, %arg1: i32) -> (i32, i32) {
    %c0_i32 = arith.constant 0 : i32
    %c0_i32_0 = arith.constant 0 : i32
    %c0_i32_1 = arith.constant 0 : i32
    return %c0_i32, %c0_i32_0 : i32, i32
  }
  func.func @transform_5(%arg0: i32, %arg1: i32) -> (i32, i32) {
    %c0_i32 = arith.constant 0 : i32
    %c0_i32_0 = arith.constant 0 : i32
    return %arg0, %c0_i32 : i32, i32
  }
}

</mosaic_0001>

<bundles_post_ra>
// kernel: tpu_custom_call.1
= control target key start
LH: loop header
LB: loop body
LE: loop exit
PB: predicated region body
PF: predicated region fallthrough
CT: control target
= control target key end

     0   :  { %v356_v1 = vmov 0.0   ;;  %vm357_vm0 = vmmov 0   ;;  %vm26_vm1 = vcmask 261120   ;;  %s443_s0 = inlined_call_operand.vmem [shape: f32[16,32], index: 0, kind: input, shape index: {}]   ;;  %s444_s1 = inlined_call_operand.vmem [shape: bf16[32,128], index: 1, kind: input, shape index: {}]   ;;  %s445_s2 = inlined_call_operand.vmem [shape: f32[1,128], index: 2, kind: input, shape index: {}]   ;;  %s446_s3 = inlined_call_operand.vmem [shape: bf16[128,32], index: 3, kind: input, shape index: {}]   ;;  %s447_s4 = inlined_call_operand.vmem [shape: f32[1,32], index: 4, kind: input, shape index: {}]   ;;  %s448_s5 = inlined_call_operand.hbm [shape: f32[16,32], index: 5, kind: output, shape index: {}]  }
   0x1   :  { %v320_v0 = vld [vmem:[%s444_s1 + $0x8] sm:$0xff]   ;;  %287 = vmatprep.subr.bf16.mxu0 %v356_v1  ;;  %295 = vmatprep.subr.bf16.mxu1 %v356_v1  ;;  %v321_v2 = vld [vmem:[%s444_s1] sm:$0xff]   ;;  %27 = vst.msk [vmem:[#allocation2] sm:$0xff] %vm26_vm1, %v356_v1  ;;  %28 = vst.msk [vmem:[#allocation2 + $0x8] sm:$0xff] %vm26_vm1, %v356_v1 }
   0x2   :  { %288 = vmatpush3.bf16.msra.mxu0 %v320_v0  ;;  %291 = vmatprep.mubr.msk.bf16.mxu0 %vm357_vm0, %v356_v1  ;;  %v29_v3 = vld [vmem:[%s443_s0] sm:$0xff]  ;;  %v30_v4 = vld [vmem:[%s443_s0 + $0x8] sm:$0xff] }
   0x3   :  { %289 = vmatprep.subr.bf16.mxu0 %v356_v1  ;;  %311 = vmatprep.mubr.msk.bf16.mxu1 %vm357_vm0, %v356_v1  ;;  %v31_v5 = vpack.c.bf16 %v30_v4, %v29_v3 }
   0x6   :  { %290 = vmatpush3.bf16.msra.mxu0 %v321_v2 }
   0x7   :  { %10 = vsyncpa [#allocation4], 0  ;;  %v322_v6 = vld [vmem:[%s446_s3 + $0x38] sm:$0xff]   ;;  %v323_v7 = vld [vmem:[%s446_s3 + $0x30] sm:$0xff]   ;;  %s358_s17 = smov [#allocation3]  }
   0x8   :  { %296 = vmatpush3.bf16.msra.mxu1 %v322_v6  ;;  %v324_v8 = vld [vmem:[%s446_s3 + $0x28] sm:$0xff]   ;;  %v325_v9 = vld [vmem:[%s446_s3 + $0x20] sm:$0xff]   ;;  %v326_v10 = vld [vmem:[%s446_s3 + $0x18] sm:$0xff]   ;;  %s251_s18 = sshll.u32 %s358_s17, 4  ;;  %s252_s18 = int_to_ptr.vmem [resolvable:$true] %s251_s18 }
   0x9   :  { %292 = vmatmul.mubr.msk.bf16.vlgmr.msra.gmra.mxu0 %vm26_vm1, %v31_v5  ;;  %297 = vmatprep.subr.bf16.mxu1 %v356_v1  ;;  %v327_v11 = vld [vmem:[%s446_s3 + $0x10] sm:$0xff]   ;;  %v328_v12 = vld [vmem:[%s446_s3 + $0x8] sm:$0xff]   ;;  %v329_v13 = vld [vmem:[%s446_s3] sm:$0xff]   ;;  %s334_s19 = scalar_lea.vmem %s252_s18, 256  ;;  %p339_p1 = scmp.lt.s32.totalorder %s252_s18, %s252_s18 }
   0xa   :  { %v262_v14 = vld [vmem:[%s445_s2] ss:$0 sm:$0xff]  ;;  %v119_v44 = vld [vmem:[#allocation2 + $0x8] sm:$0xff]  ;;  %p335_p0 = scmp.ne.s32.totalorder %s252_s18, %s334_s19  ;;  %p340_p2 = scmp.lt.s32.totalorder %s334_s19, %s334_s19 }
   0xb   :  { %v118_v40 = vld [vmem:[#allocation2] sm:$0xff] }
   0xc   :  { %298 = vmatpush3.bf16.msra.mxu1 %v323_v7  ;;  %v274_v48 = vld [vmem:[%s447_s4] ss:$0 sm:$0xff]  ;;  %p341_p3 = por %p340_p2, %p339_p1 }
   0xd   :  { %299 = vmatprep.subr.bf16.mxu1 %v356_v1 }
   0xe   :  { %p342_p4 = pnand %p341_p3, %p335_p0 }
  0x10   :  { %300 = vmatpush3.bf16.msra.mxu1 %v324_v8 }
  0x11   :  { %301 = vmatprep.subr.bf16.mxu1 %v356_v1 }
  0x14   :  { %302 = vmatpush3.bf16.msra.mxu1 %v325_v9 }
  0x15   :  { %303 = vmatprep.subr.bf16.mxu1 %v356_v1 }
  0x18   :  { %304 = vmatpush3.bf16.msra.mxu1 %v326_v10 }
  0x19   :  { %305 = vmatprep.subr.bf16.mxu1 %v356_v1 }
  0x1c   :  { %306 = vmatpush3.bf16.msra.mxu1 %v327_v11 }
  0x1d   :  { %307 = vmatprep.subr.bf16.mxu1 %v356_v1 }
  0x20   :  { %308 = vmatpush3.bf16.msra.mxu1 %v328_v12 }
  0x21   :  { %309 = vmatprep.subr.bf16.mxu1 %v356_v1 }
  0x24   :  { %310 = vmatpush3.bf16.msra.mxu1 %v329_v13 }
  0xc9   :  { %v93_v15 = vpop.f32.mrf.mxu0 }
  0xca   :  { %v94_v16 = vadd.f32 %v262_v14, %v93_v15 }
  0xcb   :  { %v293_v17 = vpop.f32.mrf.mxu0 }
  0xcc   :  { %v102_v18 = vmul.f32 %v94_v16, %v94_v16  ;;  %v100_v34 = vmul.f32 0.5, %v94_v16 }
  0xcd   :  { %v96_v19 = vpop.f32.mrf.mxu0 }
  0xce   :  { %v104_v20 = vmul.f32 %v102_v18, %v94_v16  ;;  %v97_v21 = vadd.f32 %v262_v14, %v96_v19 }
  0xcf   :  { %v294_v22 = vpop.f32.mrf.mxu0 }
  0xd0   :  { %v106_v23 = vmul.f32 0.044715, %v104_v20  ;;  %v103_v24 = vmul.f32 %v97_v21, %v97_v21  ;;  %v101_v35 = vmul.f32 0.5, %v97_v21 }
  0xd2   :  { %v108_v25 = vadd.f32 %v106_v23, %v94_v16  ;;  %v105_v26 = vmul.f32 %v103_v24, %v97_v21 }
  0xd4   :  { %v110_v27 = vmul.f32 0.7978846, %v108_v25  ;;  %v107_v28 = vmul.f32 0.044715, %v105_v26 }
  0xd6   :  { %330 = vtanh.f32 %v110_v27  ;;  %v109_v29 = vadd.f32 %v107_v28, %v97_v21 }
  0xd8   :  { %v111_v30 = vmul.f32 0.7978846, %v109_v29 }
  0xda   :  { %332 = vtanh.f32 %v111_v30 }
  0xe3   :  { %v331_v31 = vpop.eup %330 }
  0xe4   :  { %v114_v32 = vadd.f32 1.0, %v331_v31 }
  0xe6   :  { %v116_v37 = vmul.f32 %v114_v32, %v100_v34 }
  0xe7   :  { %v333_v33 = vpop.eup %332 }
  0xe8   :  { %v115_v36 = vadd.f32 1.0, %v333_v33 }
  0xea   :  { %v117_v38 = vmul.f32 %v115_v36, %v101_v35 }
  0xec   :  { %v120_v39 = vpack.c.bf16 %v117_v38, %v116_v37 }
  0xee   :  { %312 = vmatmul.mubr.bf16.vlgmr.msra.gmra.mxu1 %v120_v39 }
 0x1ae   :  { %v219_v41 = vpop.f32.mrf.mxu1 }
 0x1af   :  { %v226_v42 = vadd.f32 %v219_v41, %v118_v40 }
 0x1b0   :  { %v313_v43 = vpop.f32.mrf.mxu1 }
 0x1b1   :  { %228 = vst.msk [vmem:[#allocation2] sm:$0xff] %vm26_vm1, %v226_v42 }
 0x1b2   :  { %v222_v45 = vpop.f32.mrf.mxu1 }
 0x1b3   :  { %v227_v46 = vadd.f32 %v222_v45, %v119_v44 }
 0x1b4   :  { %v314_v47 = vpop.f32.mrf.mxu1 }
 0x1b5   :  { %229 = vst.msk [vmem:[#allocation2 + $0x8] sm:$0xff] %vm26_vm1, %v227_v46 }
 0x1b8   :  { %v233_v49 = vld [vmem:[#allocation2] sm:$0xff] }
 0x1b9   :  { %v242_v50 = vadd.f32 %v274_v48, %v233_v49 }
 0x1bb   :  { %244 = vst.msk [vmem:[#allocation3] sm:$0xff] %vm26_vm1, %v242_v50 }
 0x1bc   :  { %v234_v51 = vld [vmem:[#allocation2 + $0x8] sm:$0xff] }
 0x1bd   :  { %v243_v52 = vadd.f32 %v274_v48, %v234_v51 }
 0x1bf   :  { %245 = vst.msk [vmem:[#allocation3 + $0x8] sm:$0xff] %vm26_vm1, %v243_v52 }
 0x1c0   :  { %345 = shalt.err (!%p342_p4)
}
 0x1c1   :  { %s359_s20 = smov 128   ;;  %s360_s4 = smov 8  }
 0x1c2   :  { %257 = dma.vmem_to_hbm [thread:$0]  %s252_s18, 256, %s448_s5, [#allocation4], %s359_s20, %s359_s20, %s360_s4  }
 0x1c3   :  { %354 = dma.done.wait [#allocation4], 256  }
 0x1c4   :  { %355 = vsyncadd [#allocation4], 4294967040 }
 0x1c5   :  { %261 = vsyncpa [#allocation4], 1 }

</bundles_post_ra>
